<compile_context>
chip_gen: v7x
topology: tpu7x:2x2x1
jax: 0.10.0
libtpu: 0.0.40
codegen_flags: <defaults>
</compile_context>

<pallas_src>
import functools

import jax
import jax.numpy as jnp
from jax import lax
from jax.experimental import pallas as pl
from jax.experimental.pallas import tpu as pltpu

_LANE = 128      # lane width (last dim)
_SUBLANE = 8     # sublane width (second-to-last dim)
_NEG = -1e30     # "minus infinity" for masked (padded) class logits


def _round_up(n, m):
    return ((n + m - 1) // m) * m


def _pad2d(a, rows, cols):
    """Zero-pad a 2D array up to (rows, cols); no-op if already that shape."""
    r, c = a.shape
    if r == rows and c == cols:
        return a
    return jnp.pad(a, ((0, rows - r), (0, cols - c)))


def _prm_kernel(x_ref, w1_ref, b1_ref, w2_ref, b2_ref, out_ref, *,
                num_classes, padded_classes):
    # fc1 + bias + ReLU.  w1 is (H, D_in) (PyTorch layout); contract dim 1 of
    # x with dim 1 of w1 so no transpose is materialized anywhere.
    x = x_ref[...]                                               # (TB, D_p)
    h = lax.dot_general(x, w1_ref[...], (((1,), (1,)), ((), ())),
                        preferred_element_type=jnp.float32)      # (TB, H_p)
    h = jnp.maximum(h + b1_ref[...], 0.0)

    # fc2 + bias + ReLU.  w2 is (C, H).
    z = lax.dot_general(h, w2_ref[...], (((1,), (1,)), ((), ())),
                        preferred_element_type=jnp.float32)      # (TB, C_p)
    z = jnp.maximum(z + b2_ref[...], 0.0)

    # Mask lane-padded (fake) class columns so they do not affect max / sum.
    if num_classes != padded_classes:
        col = lax.broadcasted_iota(jnp.int32, z.shape, 1)
        z = jnp.where(col < num_classes, z, _NEG)

    # Numerically stable log_softmax over classes (dim=1).
    m = jnp.max(z, axis=-1, keepdims=True)
    shifted = z - m
    lse = jnp.log(jnp.sum(jnp.exp(shifted), axis=-1, keepdims=True))
    out_ref[...] = (shifted - lse).astype(out_ref.dtype)


@functools.partial(jax.jit, static_argnames=("batch_tile",))
def prm_forward(x, w1, b1, w2, b2, *, batch_tile=256):
    """Fused PRM forward.

    x:  (B, D_in)   w1: (H, D_in)   b1: (H,)   w2: (C, H)   b2: (C,)
    Returns (B, C) float32 log-probabilities.
    """
    B, D_in = x.shape
    H = w1.shape[0]
    C = w2.shape[0]

    # Padded (lane/sublane-aligned) sizes.
    D_p = _round_up(D_in, _LANE)
    H_p = _round_up(H, _LANE)
    C_p = _round_up(C, _LANE)
    TB = min(batch_tile, _round_up(B, _SUBLANE))
    B_p = _round_up(B, TB)

    f32 = jnp.float32
    x_p = _pad2d(x.astype(f32), B_p, D_p)
    w1_p = _pad2d(w1.astype(f32), H_p, D_p)
    b1_p = _pad2d(b1.astype(f32).reshape(1, H), 1, H_p)
    w2_p = _pad2d(w2.astype(f32), C_p, H_p)
    b2_p = _pad2d(b2.astype(f32).reshape(1, C), 1, C_p)

    kernel = functools.partial(_prm_kernel, num_classes=C, padded_classes=C_p)

    cost = pl.CostEstimate(
        flops=2 * B * (D_in * H + H * C),
        transcendentals=B * (C + 1),
        bytes_accessed=4 * (B * D_in + D_in * H + H * C + B * C),
    )

    out_p = pl.pallas_call(
        kernel,
        out_shape=jax.ShapeDtypeStruct((B_p, C_p), f32),
        grid=(B_p // TB,),
        in_specs=[
            pl.BlockSpec((TB, D_p), lambda i: (i, 0)),    # x: batch-tiled
            pl.BlockSpec((H_p, D_p), lambda i: (0, 0)),   # w1: VMEM-resident
            pl.BlockSpec((1, H_p), lambda i: (0, 0)),     # b1: VMEM-resident
            pl.BlockSpec((C_p, H_p), lambda i: (0, 0)),   # w2: VMEM-resident
            pl.BlockSpec((1, C_p), lambda i: (0, 0)),     # b2: VMEM-resident
        ],
        out_specs=pl.BlockSpec((TB, C_p), lambda i: (i, 0)),
        compiler_params=pltpu.CompilerParams(
            dimension_semantics=("parallel",),
            vmem_limit_bytes=32 * 1024 * 1024,  # safe on v5e/v6e/v7x
        ),
        cost_estimate=cost,
    )(x_p, w1_p, b1_p, w2_p, b2_p)

    return out_p[:B, :C]


def _reference(x, w1, b1, w2, b2):
    h = jnp.maximum(x @ w1.T + b1, 0.0)
    z = jnp.maximum(h @ w2.T + b2, 0.0)
    return jax.nn.log_softmax(z, axis=1)


if __name__ == "__main__":
    # Small shapes consistent with PRM(input_size, hidden_size, num_classes).
    batch, input_size, hidden_size, num_classes = 8, 32, 32, 8

    key = jax.random.PRNGKey(0)
    k_x, k_w1, k_b1, k_w2, k_b2 = jax.random.split(key, 5)

    # PyTorch-style uniform(+-1/sqrt(fan_in)) init.
    bound1 = 1.0 / (input_size ** 0.5)
    bound2 = 1.0 / (hidden_size ** 0.5)
    w1 = jax.random.uniform(k_w1, (hidden_size, input_size), jnp.float32,
                            -bound1, bound1)
    b1 = jax.random.uniform(k_b1, (hidden_size,), jnp.float32, -bound1, bound1)
    w2 = jax.random.uniform(k_w2, (num_classes, hidden_size), jnp.float32,
                            -bound2, bound2)
    b2 = jax.random.uniform(k_b2, (num_classes,), jnp.float32, -bound2, bound2)

    x = jax.random.normal(k_x, (batch, input_size), jnp.float32)

    out = prm_forward(x, w1, b1, w2, b2)
    out = jax.block_until_ready(out)

    ref = _reference(x, w1, b1, w2, b2)
    assert out.shape == (batch, num_classes)
    assert jnp.allclose(out, ref, atol=1e-5, rtol=1e-5), "mismatch vs reference"

    print("KERNEL_OK")
</pallas_src>

<mosaic_0001>
module attributes {stable_mosaic.version = 11 : i64} {
  func.func @_prm_kernel(%arg0: i32, %arg1: memref<8x128xf32, #tpu.memory_space<vmem>>, %arg2: memref<128x128xf32, #tpu.memory_space<vmem>>, %arg3: memref<1x128xf32, #tpu.memory_space<vmem>>, %arg4: memref<128x128xf32, #tpu.memory_space<vmem>>, %arg5: memref<1x128xf32, #tpu.memory_space<vmem>>, %arg6: memref<8x128xf32, #tpu.memory_space<vmem>>) attributes {dimension_semantics = [#tpu.dimension_semantics<parallel>], iteration_bounds = array<i64: 1>, scalar_prefetch = 0 : i64, scratch_operands = 0 : i64, tpu.core_type = #tpu.core_type<tc>, window_params = [{transform_indices = @transform_0, window_bounds = array<i64: 8, 128>}, {pipeline_mode = #tpu.pipeline_mode<synchronous>, transform_indices = @transform_1, window_bounds = array<i64: 128, 128>}, {pipeline_mode = #tpu.pipeline_mode<synchronous>, transform_indices = @transform_2, window_bounds = array<i64: 1, 128>}, {pipeline_mode = #tpu.pipeline_mode<synchronous>, transform_indices = @transform_3, window_bounds = array<i64: 128, 128>}, {pipeline_mode = #tpu.pipeline_mode<synchronous>, transform_indices = @transform_4, window_bounds = array<i64: 1, 128>}, {transform_indices = @transform_5, window_bounds = array<i64: 8, 128>}]} {
    %c0 = arith.constant 0 : index
    %c0_0 = arith.constant 0 : index
    %0 = vector.load %arg1[%c0, %c0_0] : memref<8x128xf32, #tpu.memory_space<vmem>>, vector<8x128xf32>
    %c0_1 = arith.constant 0 : index
    %c0_2 = arith.constant 0 : index
    %1 = vector.load %arg2[%c0_1, %c0_2] : memref<128x128xf32, #tpu.memory_space<vmem>>, vector<128x128xf32>
    %cst = arith.constant dense<0.000000e+00> : vector<8x128xf32>
    %2 = tpu.matmul %0, %1, %cst {dimension_numbers = #tpu.dot_dimension_numbers<[1], [1], [0], [0], [0, 0, 1, 0], [], []>} : vector<8x128xf32>, vector<128x128xf32>, vector<8x128xf32> -> vector<8x128xf32>
    %c0_3 = arith.constant 0 : index
    %c0_4 = arith.constant 0 : index
    %3 = vector.load %arg3[%c0_3, %c0_4] : memref<1x128xf32, #tpu.memory_space<vmem>>, vector<1x128xf32>
    %4 = vector.broadcast %3 : vector<1x128xf32> to vector<8x128xf32>
    %5 = arith.addf %2, %4 : vector<8x128xf32>
    %cst_5 = arith.constant 0.000000e+00 : f32
    %6 = vector.broadcast %cst_5 : f32 to vector<8x128xf32>
    %7 = arith.maximumf %5, %6 : vector<8x128xf32>
    %c0_6 = arith.constant 0 : index
    %c0_7 = arith.constant 0 : index
    %8 = vector.load %arg4[%c0_6, %c0_7] : memref<128x128xf32, #tpu.memory_space<vmem>>, vector<128x128xf32>
    %cst_8 = arith.constant dense<0.000000e+00> : vector<8x128xf32>
    %9 = tpu.matmul %7, %8, %cst_8 {dimension_numbers = #tpu.dot_dimension_numbers<[1], [1], [0], [0], [0, 0, 1, 0], [], []>} : vector<8x128xf32>, vector<128x128xf32>, vector<8x128xf32> -> vector<8x128xf32>
    %c0_9 = arith.constant 0 : index
    %c0_10 = arith.constant 0 : index
    %10 = vector.load %arg5[%c0_9, %c0_10] : memref<1x128xf32, #tpu.memory_space<vmem>>, vector<1x128xf32>
    %11 = vector.broadcast %10 : vector<1x128xf32> to vector<8x128xf32>
    %12 = arith.addf %9, %11 : vector<8x128xf32>
    %cst_11 = arith.constant 0.000000e+00 : f32
    %13 = vector.broadcast %cst_11 : f32 to vector<8x128xf32>
    %14 = arith.maximumf %12, %13 : vector<8x128xf32>
    %15 = tpu.iota {dimensions = array<i32: 1>} : vector<8x128xi32>
    %c8_i32 = arith.constant 8 : i32
    %16 = vector.broadcast %c8_i32 : i32 to vector<8x128xi32>
    %17 = arith.cmpi slt, %15, %16 : vector<8x128xi32>
    %cst_12 = arith.constant -1.000000e+30 : f32
    %18 = vector.broadcast %cst_12 : f32 to vector<8x128xf32>
    %19 = arith.select %17, %14, %18 : vector<8x128xi1>, vector<8x128xf32>
    %cst_13 = arith.constant dense<0xFF800000> : vector<8xf32>
    %20 = vector.multi_reduction <maximumf>, %19, %cst_13 [1] : vector<8x128xf32> to vector<8xf32>
    %21 = vector.shape_cast %20 : vector<8xf32> to vector<8x1xf32>
    %22 = vector.broadcast %21 : vector<8x1xf32> to vector<8x128xf32>
    %23 = arith.subf %19, %22 : vector<8x128xf32>
    %24 = math.exp %23 : vector<8x128xf32>
    %cst_14 = arith.constant dense<0.000000e+00> : vector<8xf32>
    %25 = vector.multi_reduction <add>, %24, %cst_14 [1] : vector<8x128xf32> to vector<8xf32>
    %26 = vector.shape_cast %25 : vector<8xf32> to vector<8x1xf32>
    %27 = math.log %26 : vector<8x1xf32>
    %28 = vector.broadcast %27 : vector<8x1xf32> to vector<8x128xf32>
    %29 = arith.subf %23, %28 : vector<8x128xf32>
    %c0_15 = arith.constant 0 : index
    %c0_16 = arith.constant 0 : index
    %30 = vector.load %arg6[%c0_15, %c0_16] : memref<8x128xf32, #tpu.memory_space<vmem>>, vector<8x128xf32>
    tpu.vector_store %arg6[%c0_15, %c0_16], %29 {strides = array<i32>} : memref<8x128xf32, #tpu.memory_space<vmem>>, vector<8x128xf32>,
    return
  }
  func.func @transform_0(%arg0: i32) -> (i32, i32) {
    %c0_i32 = arith.constant 0 : i32
    %c0_i32_0 = arith.constant 0 : i32
    return %arg0, %c0_i32 : i32, i32
  }
  func.func @transform_1(%arg0: i32) -> (i32, i32) {
    %c0_i32 = arith.constant 0 : i32
    %c0_i32_0 = arith.constant 0 : i32
    %c0_i32_1 = arith.constant 0 : i32
    return %c0_i32, %c0_i32_0 : i32, i32
  }
  func.func @transform_2(%arg0: i32) -> (i32, i32) {
    %c0_i32 = arith.constant 0 : i32
    %c0_i32_0 = arith.constant 0 : i32
    %c0_i32_1 = arith.constant 0 : i32
    return %c0_i32, %c0_i32_0 : i32, i32
  }
  func.func @transform_3(%arg0: i32) -> (i32, i32) {
    %c0_i32 = arith.constant 0 : i32
    %c0_i32_0 = arith.constant 0 : i32
    %c0_i32_1 = arith.constant 0 : i32
    return %c0_i32, %c0_i32_0 : i32, i32
  }
  func.func @transform_4(%arg0: i32) -> (i32, i32) {
    %c0_i32 = arith.constant 0 : i32
    %c0_i32_0 = arith.constant 0 : i32
    %c0_i32_1 = arith.constant 0 : i32
    return %c0_i32, %c0_i32_0 : i32, i32
  }
  func.func @transform_5(%arg0: i32) -> (i32, i32) {
    %c0_i32 = arith.constant 0 : i32
    %c0_i32_0 = arith.constant 0 : i32
    return %arg0, %c0_i32 : i32, i32
  }
}

</mosaic_0001>

<bundles_post_ra>
// kernel: prm_forward.1
= control target key start
LH: loop header
LB: loop body
LE: loop exit
PB: predicated region body
PF: predicated region fallthrough
CT: control target
= control target key end

     0   :  { %v425_v2 = vmov 0.0|0.0   ;;  %vm426_vm0 = vmmov 0   ;;  %v427_v4 = vmov 0.0   ;;  %s592_s0 = inlined_call_operand.vmem [shape: f32[8,128], index: 0, kind: input, shape index: {}]   ;;  %s593_s1 = inlined_call_operand.vmem [shape: f32[128,128], index: 1, kind: input, shape index: {}]   ;;  %s594_s2 = inlined_call_operand.vmem [shape: f32[1,128], index: 2, kind: input, shape index: {}]   ;;  %s595_s3 = inlined_call_operand.vmem [shape: f32[128,128], index: 3, kind: input, shape index: {}]   ;;  %s596_s4 = inlined_call_operand.vmem [shape: f32[1,128], index: 4, kind: input, shape index: {}]   ;;  %s597_s5 = inlined_call_operand.hbm [shape: f32[8,128], index: 5, kind: output, shape index: {}]  }
   0x1   :  { %v22_v0 = vld [vmem:[%s593_s1] sm:$0xff]  ;;  %v23_v1 = vld [vmem:[%s593_s1 + $0x8] sm:$0xff]  ;;  %345 = vmatprep.subr.bf16.mxu0 %v425_v2  ;;  %307 = vmatprep.mubr.msk.f32.mxu0 %vm426_vm0, %v427_v4  ;;  %v24_v5 = vld [vmem:[%s593_s1 + $0x10] sm:$0xff] }
   0x2   :  { %v346_v3 = vpack.c.bf16 %v23_v1, %v22_v0  ;;  %369 = vmatprep.subr.bf16.mxu1 %v425_v2  ;;  %342 = vmatprep.mubr.msk.f32.mxu1 %vm426_vm0, %v427_v4  ;;  %v25_v6 = vld [vmem:[%s593_s1 + $0x18] sm:$0xff]  ;;  %v116_v7 = vld [vmem:[%s595_s3] sm:$0xff]  ;;  %v117_v8 = vld [vmem:[%s595_s3 + $0x8] sm:$0xff] }
   0x3   :  { %v349_v9 = vpack.c.bf16 %v25_v6, %v24_v5  ;;  %v370_v10 = vpack.c.bf16 %v117_v8, %v116_v7  ;;  %v118_v11 = vld [vmem:[%s595_s3 + $0x10] sm:$0xff]  ;;  %v119_v12 = vld [vmem:[%s595_s3 + $0x18] sm:$0xff] }
   0x4   :  { %347 = vmatpush3.bf16.xpose.msra.mxu0 %v346_v3 }
   0x5   :  { %348 = vmatprep.subr.bf16.mxu0 %v425_v2  ;;  %371 = vmatpush3.bf16.xpose.msra.mxu1 %v370_v10 }
   0x6   :  { %372 = vmatprep.subr.bf16.mxu1 %v425_v2 }
   0xc   :  { %350 = vmatpush3.bf16.xpose.msra.mxu0 %v349_v9 }
   0xd   :  { %10 = vsyncpa [#allocation3], 0  ;;  %351 = vmatprep.subr.bf16.mxu0 %v425_v2  ;;  %v26_v13 = vld [vmem:[%s593_s1 + $0x20] sm:$0xff]  ;;  %v27_v14 = vld [vmem:[%s593_s1 + $0x28] sm:$0xff]  ;;  %v373_v15 = vpack.c.bf16 %v119_v12, %v118_v11  ;;  %v210_v56 = vlaneseq }
   0xe   :  { %v352_v16 = vpack.c.bf16 %v27_v14, %v26_v13  ;;  %v120_v17 = vld [vmem:[%s595_s3 + $0x20] sm:$0xff]  ;;  %v121_v18 = vld [vmem:[%s595_s3 + $0x28] sm:$0xff]  ;;  %v28_v19 = vld [vmem:[%s593_s1 + $0x30] sm:$0xff] }
   0xf   :  { %374 = vmatpush3.bf16.xpose.msra.mxu1 %v373_v15  ;;  %v29_v20 = vld [vmem:[%s593_s1 + $0x38] sm:$0xff]  ;;  %v376_v21 = vpack.c.bf16 %v121_v18, %v120_v17  ;;  %v122_v23 = vld [vmem:[%s595_s3 + $0x30] sm:$0xff]  ;;  %v30_v25 = vld [vmem:[%s593_s1 + $0x40] sm:$0xff]  ;;  %v211_v58 = vand.u32 127, %v210_v56 }
  0x10   :  { %375 = vmatprep.subr.bf16.mxu1 %v425_v2  ;;  %v355_v22 = vpack.c.bf16 %v29_v20, %v28_v19  ;;  %v123_v24 = vld [vmem:[%s595_s3 + $0x38] sm:$0xff]  ;;  %v31_v26 = vld [vmem:[%s593_s1 + $0x48] sm:$0xff]  ;;  %v124_v29 = vld [vmem:[%s595_s3 + $0x40] sm:$0xff] }
  0x11   :  { %v379_v27 = vpack.c.bf16 %v123_v24, %v122_v23  ;;  %v358_v28 = vpack.c.bf16 %v31_v26, %v30_v25  ;;  %v125_v30 = vld [vmem:[%s595_s3 + $0x48] sm:$0xff]  ;;  %v32_v31 = vld [vmem:[%s593_s1 + $0x50] sm:$0xff]  ;;  %v33_v32 = vld [vmem:[%s593_s1 + $0x58] sm:$0xff]  ;;  %vm212_vm1 = vcmp.lt.s32.totalorder %v211_v58, 8 }
  0x12   :  { %v382_v33 = vpack.c.bf16 %v125_v30, %v124_v29  ;;  %v361_v34 = vpack.c.bf16 %v33_v32, %v32_v31  ;;  %v126_v35 = vld [vmem:[%s595_s3 + $0x50] sm:$0xff]  ;;  %v127_v36 = vld [vmem:[%s595_s3 + $0x58] sm:$0xff]  ;;  %v34_v37 = vld [vmem:[%s593_s1 + $0x60] sm:$0xff] }
  0x13   :  { %v35_v38 = vld [vmem:[%s593_s1 + $0x68] sm:$0xff]  ;;  %v385_v39 = vpack.c.bf16 %v127_v36, %v126_v35  ;;  %v128_v41 = vld [vmem:[%s595_s3 + $0x60] sm:$0xff]  ;;  %v36_v43 = vld [vmem:[%s593_s1 + $0x70] sm:$0xff] }
  0x14   :  { %353 = vmatpush3.bf16.xpose.msra.mxu0 %v352_v16  ;;  %v364_v40 = vpack.c.bf16 %v35_v38, %v34_v37  ;;  %v129_v42 = vld [vmem:[%s595_s3 + $0x68] sm:$0xff]  ;;  %v37_v44 = vld [vmem:[%s593_s1 + $0x78] sm:$0xff]  ;;  %v130_v47 = vld [vmem:[%s595_s3 + $0x70] sm:$0xff] }
  0x15   :  { %354 = vmatprep.subr.bf16.mxu0 %v425_v2  ;;  %v388_v45 = vpack.c.bf16 %v129_v42, %v128_v41  ;;  %v367_v46 = vpack.c.bf16 %v37_v44, %v36_v43  ;;  %v131_v48 = vld [vmem:[%s595_s3 + $0x78] sm:$0xff]  ;;  %v21_v50 = vld [vmem:[%s592_s0] sm:$0xff]  ;;  %s428_s0 = smov [#allocation2]  }
  0x16   :  { %v391_v49 = vpack.c.bf16 %v131_v48, %v130_v47  ;;  %v239_v51 = vld [vmem:[%s594_s2] ss:$0 sm:$0xff]  ;;  %s231_s2 = sshll.u32 %s428_s0, 4  ;;  %s232_s2 = int_to_ptr.vmem [resolvable:$true] %s231_s2 }
  0x17   :  { %377 = vmatpush3.bf16.xpose.msra.mxu1 %v376_v21  ;;  %v240_v57 = vld [vmem:[%s596_s4] ss:$0 sm:$0xff]  ;;  %s401_s4 = scalar_lea.vmem %s232_s2, 128  ;;  %p406_p1 = scmp.lt.s32.totalorder %s232_s2, %s232_s2 }
  0x18   :  { %378 = vmatprep.subr.bf16.mxu1 %v425_v2  ;;  %p402_p0 = scmp.ne.s32.totalorder %s232_s2, %s401_s4  ;;  %p407_p2 = scmp.lt.s32.totalorder %s401_s4, %s401_s4 }
  0x1a   :  { %p408_p3 = por %p407_p2, %p406_p1 }
  0x1c   :  { %356 = vmatpush3.bf16.xpose.msra.mxu0 %v355_v22  ;;  %p409_p4 = pnand %p408_p3, %p402_p0 }
  0x1d   :  { %357 = vmatprep.subr.bf16.mxu0 %v425_v2 }
  0x1f   :  { %380 = vmatpush3.bf16.xpose.msra.mxu1 %v379_v27 }
  0x20   :  { %381 = vmatprep.subr.bf16.mxu1 %v425_v2 }
  0x24   :  { %359 = vmatpush3.bf16.xpose.msra.mxu0 %v358_v28 }
  0x25   :  { %360 = vmatprep.subr.bf16.mxu0 %v425_v2 }
  0x27   :  { %383 = vmatpush3.bf16.xpose.msra.mxu1 %v382_v33 }
  0x28   :  { %384 = vmatprep.subr.bf16.mxu1 %v425_v2 }
  0x2c   :  { %362 = vmatpush3.bf16.xpose.msra.mxu0 %v361_v34 }
  0x2d   :  { %363 = vmatprep.subr.bf16.mxu0 %v425_v2 }
  0x2f   :  { %386 = vmatpush3.bf16.xpose.msra.mxu1 %v385_v39 }
  0x30   :  { %387 = vmatprep.subr.bf16.mxu1 %v425_v2 }
  0x34   :  { %365 = vmatpush3.bf16.xpose.msra.mxu0 %v364_v40 }
  0x35   :  { %366 = vmatprep.subr.bf16.mxu0 %v425_v2 }
  0x37   :  { %389 = vmatpush3.bf16.xpose.msra.mxu1 %v388_v45 }
  0x38   :  { %390 = vmatprep.subr.bf16.mxu1 %v425_v2 }
  0x3c   :  { %368 = vmatpush3.bf16.xpose.msra.mxu0 %v367_v46 }
  0x3f   :  { %392 = vmatpush3.bf16.xpose.msra.mxu1 %v391_v49 }
  0x43   :  { %308 = vmatmul.mubr.f32.vlgmr.msra.gmra.mrb[0].mxu0 %v21_v50 }
 0x116   :  { %v111_v52 = vpop.f32.mrb[0].mxu0 }
 0x117   :  { %v112_v53 = vadd.f32 %v239_v51, %v111_v52  ;;  %v309_v54 = vpop.f32.mrb[1].mxu0 }
 0x119   :  { %v115_v55 = vmax.f32 %v112_v53, 0.0 }
 0x11b   :  { %343 = vmatmul.mubr.f32.vlgmr.msra.gmra.mrb[0].mxu1 %v115_v55 }
 0x1ee   :  { %v205_v59 = vpop.f32.mrb[0].mxu1 }
 0x1ef   :  { %v206_v60 = vadd.f32 %v240_v57, %v205_v59  ;;  %v344_v61 = vpop.f32.mrb[1].mxu1 }
 0x1f1   :  { %v209_v62 = vmax.f32 %v206_v60, 0.0 }
 0x1f3   :  { %v213_v63 = vsel %vm212_vm1, %v209_v62, -1e+30 }
 0x1f4   :  { %214 = vmax.xlane.f32.xlu0 %v213_v63 }
 0x281   :  { %v215_v0 = vpop.xlane.xlu0 %214 }
 0x282   :  { %v216_v1 = vsub.f32 %v213_v63, %v215_v0 }
 0x284   :  { %v217_v2 = vmul.f32 1.442695, %v216_v1 }
 0x286   :  { %397 = vpow2.f32 %v217_v2 }
 0x290   :  { %v398_v3 = vpop.eup %397 }
 0x291   :  { %219 = vadd.xlane.f32.xlu0 %v398_v3 }
 0x31e   :  { %v220_v4 = vpop.xlane.xlu0 %219 }
 0x31f   :  { %399 = vlog2.f32 %v220_v4 }
 0x329   :  { %v400_v5 = vpop.eup %399 }
 0x32a   :  { %v222_v6 = vmul.f32 0.6931472, %v400_v5 }
 0x32c   :  { %v223_v7 = vsub.f32 %v216_v1, %v222_v6 }
 0x32e   :  { %224 = vst [vmem:[#allocation2] sm:$0xff] %v223_v7 }
 0x32f   :  { %412 = shalt.err (!%p409_p4)
}
 0x330   :  { %s413_s13 = scalar_lea.hbm %s597_s5, 128 }
 0x331   :  { %p414_p5 = scmp.ne.s32.totalorder %s597_s5, %s413_s13  ;;  %p417_p6 = scmp.lt.u32.totalorder %s413_s13, %s597_s5 }
 0x333   :  { %p419_p7 = pnand %p417_p6, %p414_p5 }
 0x335   :  { %422 = shalt.err (!%p419_p7)
}
 0x336   :  { %234 = dma.vmem_to_hbm [thread:$0]  %s232_s2, 128, %s597_s5, [#allocation3]  }
 0x337   :  { %423 = dma.done.wait [#allocation3], 128  }
 0x338   :  { %424 = vsyncadd [#allocation3], 4294967168 }
 0x339   :  { %238 = vsyncpa [#allocation3], 1 }

</bundles_post_ra>
